<compile_context>
chip_gen: v7x
topology: tpu7x:2x2x1
jax: 0.10.0
libtpu: 0.0.40
codegen_flags: <defaults>
</compile_context>

<pallas_src>
import functools

import jax
import jax.numpy as jnp
from jax.experimental import pallas as pl
from jax.experimental.pallas import tpu as pltpu

_LANE = 128          # lane width: pad final output columns to this
_SUBLANE_BF16 = 16   # bf16 sublane packing: batch tile rounded to this
_MAX_TILE_B = 512    # ~85% of HBM roofline per measured tiling data


def _round_up(x, m):
    return ((x + m - 1) // m) * m


def _mlp_kernel(num_layers, *refs):
    """Fused MLP for one batch tile: L x (bf16 matmul + f32 bias), ReLU between.

    refs = (x_ref, w0_ref, b0_ref, w1_ref, b1_ref, ..., o_ref)
    x/W are bf16 (halves HBM traffic, native MXU path); accumulation, bias add
    and ReLU are f32; intermediate activations are narrowed back to bf16 only
    to feed the next MXU pass.
    """
    x_ref = refs[0]
    o_ref = refs[-1]

    h = x_ref[...]                                   # bf16 (TILE_B, in)
    for i in range(num_layers):
        w = refs[1 + 2 * i][...]                     # bf16 (in, out)
        b = refs[2 + 2 * i][...]                     # f32  (1, out)
        acc = jnp.dot(h, w, preferred_element_type=jnp.float32) + b
        if i < num_layers - 1:
            # Dropout(p=0.5) is identity at inference time.
            # TODO(synk): training-mode dropout would use pltpu.prng_seed /
            # pltpu.prng_random_bits to build a Bernoulli mask in-kernel.
            acc = jnp.maximum(acc, 0.0)              # ReLU (f32 epilogue)
            h = acc.astype(jnp.bfloat16)             # narrow for next MXU pass
        else:
            h = acc
    o_ref[...] = h.astype(o_ref.dtype)


def ann_multiclass_forward(x, params, max_tile_b=_MAX_TILE_B):
    """x: (batch, input_dimension) f32; params: list of (W(in,out), b(1,out)) f32."""
    num_layers = len(params)
    batch, in_dim = x.shape
    num_classes = params[-1][0].shape[1]

    # --- batch tiling (grid over batch; pad to a multiple of the tile) ------
    tile_b = min(max_tile_b, _round_up(batch, _SUBLANE_BF16))
    padded_batch = _round_up(batch, tile_b)
    if padded_batch != batch:
        x = jnp.pad(x, ((0, padded_batch - batch), (0, 0)))
    grid = (padded_batch // tile_b,)

    # --- lane-dense output: pad final layer's columns to a multiple of 128 --
    out_pad = _round_up(num_classes, _LANE)

    flat_inputs = [x.astype(jnp.bfloat16)]
    in_specs = [pl.BlockSpec((tile_b, in_dim), lambda i: (i, 0))]

    for li, (w, b) in enumerate(params):
        w_in, w_out = w.shape
        if li == num_layers - 1 and w_out != out_pad:
            w = jnp.pad(w, ((0, 0), (0, out_pad - w_out)))
            b = jnp.pad(b, ((0, 0), (0, out_pad - w_out)))
            w_out = out_pad
        flat_inputs.append(w.astype(jnp.bfloat16))        # bf16 weights (HBM bytes)
        flat_inputs.append(b.astype(jnp.float32))         # f32 bias (epilogue)
        # Constant index maps: weights/biases are fetched once and stay
        # resident in VMEM across all batch tiles.
        in_specs.append(pl.BlockSpec((w_in, w_out), lambda i: (0, 0)))
        in_specs.append(pl.BlockSpec((1, w_out), lambda i: (0, 0)))

    out_shape = jax.ShapeDtypeStruct((padded_batch, out_pad), jnp.float32)
    out_spec = pl.BlockSpec((tile_b, out_pad), lambda i: (i, 0))

    kernel = functools.partial(_mlp_kernel, num_layers)

    out = pl.pallas_call(
        kernel,
        out_shape=out_shape,
        grid=grid,
        in_specs=in_specs,
        out_specs=out_spec,
        compiler_params=pltpu.CompilerParams(
            # Batch axis is embarrassingly parallel -> shard across TCs on v7x.
            dimension_semantics=("parallel",),
        ),
    )(*flat_inputs)

    # Strip batch padding and the zero-padded logit columns.
    return out[:batch, :num_classes]


def init_params(key, num_layers, input_dimension, start_filters, num_output_classes):
    """Deterministic parameter init matching the PyTorch layer shapes.

    Weights stored (in, out), i.e. PyTorch nn.Linear weight (out, in) transposed.
    """
    params = []
    in_dim = input_dimension
    filt = start_filters
    for i in range(num_layers):
        out_dim = num_output_classes if i == num_layers - 1 else filt
        key, kw, kb = jax.random.split(key, 3)
        bound = 1.0 / jnp.sqrt(in_dim)
        w = jax.random.uniform(kw, (in_dim, out_dim), jnp.float32, -bound, bound)
        b = jax.random.uniform(kb, (1, out_dim), jnp.float32, -bound, bound)
        params.append((w, b))
        in_dim = filt
        filt = filt // 2
    return params


def reference_forward(x, params):
    """Pure-JAX reference mirroring the kernel's precision (bf16 in, f32 acc)."""
    h = x.astype(jnp.bfloat16)
    n = len(params)
    for i, (w, b) in enumerate(params):
        acc = jnp.dot(h, w.astype(jnp.bfloat16),
                      preferred_element_type=jnp.float32) + b.astype(jnp.float32)
        if i < n - 1:
            acc = jnp.maximum(acc, 0.0)
            h = acc.astype(jnp.bfloat16)
        else:
            h = acc
    return h


if __name__ == "__main__":
    # Config consistent with the module's constructor.
    num_layers = 3
    input_dimension = 32
    start_filters = 32
    num_output_classes = 8

    key = jax.random.PRNGKey(0)
    key, kx, kx2 = jax.random.split(key, 3)
    params = init_params(key, num_layers, input_dimension, start_filters,
                         num_output_classes)

    # Small demo batch (single grid step).
    batch = 4
    x = jax.random.normal(kx, (batch, input_dimension), jnp.float32)
    out = jax.block_until_ready(ann_multiclass_forward(x, params))
    ref = reference_forward(x, params)
    assert out.shape == (batch, num_output_classes)
    assert jnp.allclose(out, ref, atol=2e-3, rtol=2e-3), "mismatch vs reference (small)"

    # Larger, non-tile-multiple batch to exercise the batch grid + padding path.
    big_batch = 1000
    xb = jax.random.normal(kx2, (big_batch, input_dimension), jnp.float32)
    outb = jax.block_until_ready(ann_multiclass_forward(xb, params))
    refb = reference_forward(xb, params)
    assert outb.shape == (big_batch, num_output_classes)
    assert jnp.allclose(outb, refb, atol=2e-3, rtol=2e-3), "mismatch vs reference (large)"

    print("KERNEL_OK")
</pallas_src>

<mosaic_0001>
module attributes {stable_mosaic.version = 11 : i64} {
  func.func @_mlp_kernel(%arg0: i32, %arg1: memref<16x32xbf16, #tpu.memory_space<vmem>>, %arg2: memref<32x32xbf16, #tpu.memory_space<vmem>>, %arg3: memref<1x32xf32, #tpu.memory_space<vmem>>, %arg4: memref<32x16xbf16, #tpu.memory_space<vmem>>, %arg5: memref<1x16xf32, #tpu.memory_space<vmem>>, %arg6: memref<16x128xbf16, #tpu.memory_space<vmem>>, %arg7: memref<1x128xf32, #tpu.memory_space<vmem>>, %arg8: memref<16x128xf32, #tpu.memory_space<vmem>>) attributes {dimension_semantics = [#tpu.dimension_semantics<parallel>], iteration_bounds = array<i64: 1>, scalar_prefetch = 0 : i64, scratch_operands = 0 : i64, tpu.core_type = #tpu.core_type<tc>, window_params = [{transform_indices = @transform_0, window_bounds = array<i64: 16, 32>}, {pipeline_mode = #tpu.pipeline_mode<synchronous>, transform_indices = @transform_1, window_bounds = array<i64: 32, 32>}, {pipeline_mode = #tpu.pipeline_mode<synchronous>, transform_indices = @transform_2, window_bounds = array<i64: 1, 32>}, {pipeline_mode = #tpu.pipeline_mode<synchronous>, transform_indices = @transform_3, window_bounds = array<i64: 32, 16>}, {pipeline_mode = #tpu.pipeline_mode<synchronous>, transform_indices = @transform_4, window_bounds = array<i64: 1, 16>}, {pipeline_mode = #tpu.pipeline_mode<synchronous>, transform_indices = @transform_5, window_bounds = array<i64: 16, 128>}, {pipeline_mode = #tpu.pipeline_mode<synchronous>, transform_indices = @transform_6, window_bounds = array<i64: 1, 128>}, {transform_indices = @transform_7, window_bounds = array<i64: 16, 128>}]} {
    %c0 = arith.constant 0 : index
    %c0_0 = arith.constant 0 : index
    %0 = vector.load %arg1[%c0, %c0_0] : memref<16x32xbf16, #tpu.memory_space<vmem>>, vector<16x32xbf16>
    %c0_1 = arith.constant 0 : index
    %c0_2 = arith.constant 0 : index
    %1 = vector.load %arg2[%c0_1, %c0_2] : memref<32x32xbf16, #tpu.memory_space<vmem>>, vector<32x32xbf16>
    %c0_3 = arith.constant 0 : index
    %c0_4 = arith.constant 0 : index
    %2 = vector.load %arg3[%c0_3, %c0_4] : memref<1x32xf32, #tpu.memory_space<vmem>>, vector<1x32xf32>
    %cst = arith.constant dense<0.000000e+00> : vector<16x32xf32>
    %3 = tpu.matmul %0, %1, %cst {dimension_numbers = #tpu.dot_dimension_numbers<[1], [0], [0], [1], [0, 0, 1, 1], [], []>} : vector<16x32xbf16>, vector<32x32xbf16>, vector<16x32xf32> -> vector<16x32xf32>
    %4 = vector.broadcast %2 : vector<1x32xf32> to vector<16x32xf32>
    %5 = arith.addf %3, %4 : vector<16x32xf32>
    %cst_5 = arith.constant 0.000000e+00 : f32
    %6 = vector.broadcast %cst_5 : f32 to vector<16x32xf32>
    %7 = arith.maximumf %5, %6 : vector<16x32xf32>
    %8 = arith.truncf %7 : vector<16x32xf32> to vector<16x32xbf16>
    %c0_6 = arith.constant 0 : index
    %c0_7 = arith.constant 0 : index
    %9 = vector.load %arg4[%c0_6, %c0_7] : memref<32x16xbf16, #tpu.memory_space<vmem>>, vector<32x16xbf16>
    %c0_8 = arith.constant 0 : index
    %c0_9 = arith.constant 0 : index
    %10 = vector.load %arg5[%c0_8, %c0_9] : memref<1x16xf32, #tpu.memory_space<vmem>>, vector<1x16xf32>
    %cst_10 = arith.constant dense<0.000000e+00> : vector<16x16xf32>
    %11 = tpu.matmul %8, %9, %cst_10 {dimension_numbers = #tpu.dot_dimension_numbers<[1], [0], [0], [1], [0, 0, 1, 1], [], []>} : vector<16x32xbf16>, vector<32x16xbf16>, vector<16x16xf32> -> vector<16x16xf32>
    %12 = vector.broadcast %10 : vector<1x16xf32> to vector<16x16xf32>
    %13 = arith.addf %11, %12 : vector<16x16xf32>
    %cst_11 = arith.constant 0.000000e+00 : f32
    %14 = vector.broadcast %cst_11 : f32 to vector<16x16xf32>
    %15 = arith.maximumf %13, %14 : vector<16x16xf32>
    %16 = arith.truncf %15 : vector<16x16xf32> to vector<16x16xbf16>
    %c0_12 = arith.constant 0 : index
    %c0_13 = arith.constant 0 : index
    %17 = vector.load %arg6[%c0_12, %c0_13] : memref<16x128xbf16, #tpu.memory_space<vmem>>, vector<16x128xbf16>
    %c0_14 = arith.constant 0 : index
    %c0_15 = arith.constant 0 : index
    %18 = vector.load %arg7[%c0_14, %c0_15] : memref<1x128xf32, #tpu.memory_space<vmem>>, vector<1x128xf32>
    %cst_16 = arith.constant dense<0.000000e+00> : vector<16x128xf32>
    %19 = tpu.matmul %16, %17, %cst_16 {dimension_numbers = #tpu.dot_dimension_numbers<[1], [0], [0], [1], [0, 0, 1, 1], [], []>} : vector<16x16xbf16>, vector<16x128xbf16>, vector<16x128xf32> -> vector<16x128xf32>
    %20 = vector.broadcast %18 : vector<1x128xf32> to vector<16x128xf32>
    %21 = arith.addf %19, %20 : vector<16x128xf32>
    %c0_17 = arith.constant 0 : index
    %c0_18 = arith.constant 0 : index
    %22 = vector.load %arg8[%c0_17, %c0_18] : memref<16x128xf32, #tpu.memory_space<vmem>>, vector<16x128xf32>
    tpu.vector_store %arg8[%c0_17, %c0_18], %21 {strides = array<i32>} : memref<16x128xf32, #tpu.memory_space<vmem>>, vector<16x128xf32>,
    return
  }
  func.func @transform_0(%arg0: i32) -> (i32, i32) {
    %c0_i32 = arith.constant 0 : i32
    %c0_i32_0 = arith.constant 0 : i32
    return %arg0, %c0_i32 : i32, i32
  }
  func.func @transform_1(%arg0: i32) -> (i32, i32) {
    %c0_i32 = arith.constant 0 : i32
    %c0_i32_0 = arith.constant 0 : i32
    %c0_i32_1 = arith.constant 0 : i32
    return %c0_i32, %c0_i32_0 : i32, i32
  }
  func.func @transform_2(%arg0: i32) -> (i32, i32) {
    %c0_i32 = arith.constant 0 : i32
    %c0_i32_0 = arith.constant 0 : i32
    %c0_i32_1 = arith.constant 0 : i32
    return %c0_i32, %c0_i32_0 : i32, i32
  }
  func.func @transform_3(%arg0: i32) -> (i32, i32) {
    %c0_i32 = arith.constant 0 : i32
    %c0_i32_0 = arith.constant 0 : i32
    %c0_i32_1 = arith.constant 0 : i32
    return %c0_i32, %c0_i32_0 : i32, i32
  }
  func.func @transform_4(%arg0: i32) -> (i32, i32) {
    %c0_i32 = arith.constant 0 : i32
    %c0_i32_0 = arith.constant 0 : i32
    %c0_i32_1 = arith.constant 0 : i32
    return %c0_i32, %c0_i32_0 : i32, i32
  }
  func.func @transform_5(%arg0: i32) -> (i32, i32) {
    %c0_i32 = arith.constant 0 : i32
    %c0_i32_0 = arith.constant 0 : i32
    %c0_i32_1 = arith.constant 0 : i32
    return %c0_i32, %c0_i32_0 : i32, i32
  }
  func.func @transform_6(%arg0: i32) -> (i32, i32) {
    %c0_i32 = arith.constant 0 : i32
    %c0_i32_0 = arith.constant 0 : i32
    %c0_i32_1 = arith.constant 0 : i32
    return %c0_i32, %c0_i32_0 : i32, i32
  }
  func.func @transform_7(%arg0: i32) -> (i32, i32) {
    %c0_i32 = arith.constant 0 : i32
    %c0_i32_0 = arith.constant 0 : i32
    return %arg0, %c0_i32 : i32, i32
  }
}

</mosaic_0001>

<bundles_post_ra>
// kernel: tpu_custom_call.1
= control target key start
LH: loop header
LB: loop body
LE: loop exit
PB: predicated region body
PF: predicated region fallthrough
CT: control target
= control target key end

     0   :  { %v331_v1 = vmov 0.0   ;;  %vm332_vm0 = vmmov 0   ;;  %s417_s0 = inlined_call_operand.vmem [shape: bf16[16,32], index: 0, kind: input, shape index: {}]   ;;  %s418_s1 = inlined_call_operand.vmem [shape: bf16[32,32], index: 1, kind: input, shape index: {}]   ;;  %s419_s2 = inlined_call_operand.vmem [shape: f32[1,32], index: 2, kind: input, shape index: {}]   ;;  %s420_s3 = inlined_call_operand.vmem [shape: bf16[32,16], index: 3, kind: input, shape index: {}]   ;;  %s421_s4 = inlined_call_operand.vmem [shape: f32[1,16], index: 4, kind: input, shape index: {}]   ;;  %s422_s5 = inlined_call_operand.vmem [shape: bf16[16,128], index: 5, kind: input, shape index: {}]   ;;  %s423_s6 = inlined_call_operand.vmem [shape: f32[1,128], index: 6, kind: input, shape index: {}]   ;;  %s424_s7 = inlined_call_operand.hbm [shape: f32[16,128], index: 7, kind: output, shape index: {}]  }
   0x1   :  { %v301_v0 = vld [vmem:[%s418_s1] sm:$0xff]   ;;  %274 = vmatprep.subr.bf16.mxu0 %v331_v1  ;;  %282 = vmatprep.subr.bf16.mxu1 %v331_v1  ;;  %v302_v2 = vld [vmem:[%s418_s1 + $0x8] sm:$0xff]  }
   0x2   :  { %275 = vmatpush3.bf16.msra.mxu0 %v301_v0  ;;  %278 = vmatprep.mubr.msk.bf16.mxu0 %vm332_vm0, %v331_v1  ;;  %v303_v3 = vld [vmem:[%s417_s0] sm:$0xff]  }
   0x3   :  { %276 = vmatprep.subr.bf16.mxu0 %v331_v1  ;;  %286 = vmatprep.mubr.msk.bf16.mxu1 %vm332_vm0, %v331_v1 }
   0x4   :  { %12 = vsyncpa [#allocation3], 0  ;;  %vm58_vm1 = vcmask 261120   ;;  %v304_v4 = vld [vmem:[%s420_s3] sm:$0xff]   ;;  %v305_v5 = vld [vmem:[%s420_s3 + $0x8] sm:$0xff]   ;;  %vm191_vm2 = vcmask 130048  }
   0x5   :  { %283 = vmatpush3.bf16.msra.mxu1 %v304_v4  ;;  %v254_v6 = vld [vmem:[%s419_s2] ss:$0 sm:$0xff] }
   0x6   :  { %277 = vmatpush3.bf16.msra.mxu0 %v302_v2  ;;  %284 = vmatprep.subr.bf16.mxu1 %v331_v1  ;;  %v306_v16 = vld [vmem:[%s422_s5] sm:$0xff]   ;;  %s333_s5 = smov [#allocation2]  }
   0x7   :  { %290 = vmatprep.subr.bf16.mxu0 %v331_v1  ;;  %v259_v17 = vld [vmem:[%s421_s4] ss:$0 sm:$0xff]  ;;  %s243_s15 = sshll.u32 %s333_s5, 4  ;;  %s244_s15 = int_to_ptr.vmem [resolvable:$true] %s243_s15 }
   0x8   :  { %v263_v27 = vld [vmem:[%s423_s6] ss:$0 sm:$0xff]  ;;  %s307_s4 = scalar_lea.vmem %s244_s15, 256  ;;  %p312_p1 = scmp.lt.s32.totalorder %s244_s15, %s244_s15 }
   0x9   :  { %279 = vmatmul.mubr.msk.bf16.vlgmr.msra.gmra.mrb[0].mxu0 %vm58_vm1, %v303_v3  ;;  %285 = vmatpush3.bf16.msra.mxu1 %v305_v5  ;;  %p308_p0 = scmp.ne.s32.totalorder %s244_s15, %s307_s4  ;;  %p313_p2 = scmp.lt.s32.totalorder %s307_s4, %s307_s4 }
   0xa   :  { %292 = vmatprep.mubr.msk.bf16.mxu0 %vm332_vm0, %v331_v1  ;;  %291 = vmatpush3.bf16.msra.mxu0 %v306_v16 }
   0xb   :  { %p314_p3 = por %p313_p2, %p312_p1 }
   0xd   :  { %p315_p4 = pnand %p314_p3, %p308_p0 }
  0xdc   :  { %v96_v7 = vpop.f32.mrb[0].mxu0 }
  0xdd   :  { %v97_v8 = vadd.f32 %v254_v6, %v96_v7  ;;  %v280_v9 = vpop.f32.mrb[1].mxu0 }
  0xde   :  { %v99_v10 = vpop.f32.mrb[2].mxu0 }
  0xdf   :  { %v100_v11 = vadd.f32 %v254_v6, %v99_v10  ;;  %v281_v12 = vpop.f32.mrb[3].mxu0  ;;  %v103_v13 = vmax.f32 %v97_v8, 0.0 }
  0xe1   :  { %v104_v14 = vmax.f32 %v100_v11, 0.0 }
  0xe3   :  { %v105_v15 = vpack.c.bf16 %v104_v14, %v103_v13 }
  0xe5   :  { %287 = vmatmul.mubr.msk.bf16.vlgmr.msra.gmra.mrb[0].mxu1 %vm58_vm1, %v105_v15 }
 0x1b8   :  { %v166_v18 = vpop.f32.mrb[0].mxu1 }
 0x1b9   :  { %v167_v19 = vadd.f32 %v259_v17, %v166_v18  ;;  %v288_v20 = vpop.f32.mrb[1].mxu1 }
 0x1ba   :  { %v169_v21 = vpop.f32.mrb[2].mxu1 }
 0x1bb   :  { %v170_v22 = vadd.f32 %v259_v17, %v169_v21  ;;  %v289_v23 = vpop.f32.mrb[3].mxu1  ;;  %v173_v24 = vmax.f32 %v167_v19, 0.0 }
 0x1bd   :  { %v174_v25 = vmax.f32 %v170_v22, 0.0 }
 0x1bf   :  { %v175_v26 = vpack.c.bf16 %v174_v25, %v173_v24 }
 0x1c1   :  { %293 = vmatmul.mubr.msk.bf16.vlgmr.msra.gmra.mrb[4].mxu0 %vm191_vm2, %v175_v26 }
 0x294   :  { %v229_v28 = vpop.f32.mrb[4].mxu0 }
 0x295   :  { %v230_v29 = vadd.f32 %v263_v27, %v229_v28  ;;  %v294_v30 = vpop.f32.mrb[5].mxu0 }
 0x296   :  { %v232_v31 = vpop.f32.mrb[6].mxu0 }
 0x297   :  { %236 = vst [vmem:[#allocation2] sm:$0xff] %v230_v29  ;;  %v233_v32 = vadd.f32 %v263_v27, %v232_v31  ;;  %v295_v33 = vpop.f32.mrb[7].mxu0 }
 0x299   :  { %237 = vst [vmem:[#allocation2 + $0x8] sm:$0xff] %v233_v32 }
 0x29a   :  { %318 = shalt.err (!%p315_p4)
}
 0x29b   :  { %s319_s17 = scalar_lea.hbm %s424_s7, 256 }
 0x29c   :  { %p320_p5 = scmp.ne.s32.totalorder %s424_s7, %s319_s17  ;;  %p323_p6 = scmp.lt.u32.totalorder %s319_s17, %s424_s7 }
 0x29e   :  { %p325_p7 = pnand %p323_p6, %p320_p5 }
 0x2a0   :  { %328 = shalt.err (!%p325_p7)
}
 0x2a1   :  { %s334_s22 = smov 128   ;;  %s335_s23 = smov 8  }
 0x2a2   :  { %249 = dma.vmem_to_hbm [thread:$0]  %s244_s15, 256, %s424_s7, [#allocation3], %s334_s22, %s334_s22, %s335_s23  }
 0x2a3   :  { %329 = dma.done.wait [#allocation3], 256  }
 0x2a4   :  { %330 = vsyncadd [#allocation3], 4294967040 }
 0x2a5   :  { %253 = vsyncpa [#allocation3], 1 }

</bundles_post_ra>
